<compile_context>
chip_gen: v7x
topology: tpu7x:2x2x1
jax: 0.10.0
libtpu: 0.0.40
codegen_flags: <defaults>
</compile_context>

<pallas_src>
import functools

import numpy as np

import jax
import jax.numpy as jnp
from jax.experimental import pallas as pl
from jax.experimental.pallas import tpu as pltpu


# ----------------------------------------------------------------------------
# Static model constants
# ----------------------------------------------------------------------------
CIN = 45                       # channels per coupling half (z1 / z2)
C_PAD = 48                     # 45 padded to a sublane-aligned 48 (pad rows stay 0)
K_EXPERTS = 4                  # Dynamic_conv2d experts
HID = 12                       # int(45 * 0.25) + 1
HID_PAD = 16                   # padded hidden width (pad rows/cols are zero)
TEMPERATURE = 34.0             # canonical Dynamic_conv2d softmax temperature

DILATIONS = (1, 2, 3)
# tap t = 9*dilation_group + 3*ky + kx  ->  spatial offset (dy, dx)
DILATED_TAPS = tuple(((ky - 1) * d, (kx - 1) * d)
                     for d in DILATIONS for ky in range(3) for kx in range(3))   # 27
CONV3X3_TAPS = tuple((dy, dx) for dy in (-1, 0, 1) for dx in (-1, 0, 1))          # 9
N_TAPS = len(DILATED_TAPS) + len(CONV3X3_TAPS)                                    # 36


# ----------------------------------------------------------------------------
# Helpers (static shapes -> jaxpr constants)
# ----------------------------------------------------------------------------
def _tap_masks(taps, H, W):
    """0/1 masks (T, 1, S): output pixels whose shifted tap stays in-bounds
    (== 'same' zero padding). Pure numpy on static shapes -> trace-time constant."""
    hh, ww = np.divmod(np.arange(H * W), W)
    m = [((hh + dy >= 0) & (hh + dy < H) & (ww + dx >= 0) & (ww + dx < W))
         for dy, dx in taps]
    return jnp.asarray(np.stack(m).astype(np.float32)[:, None, :])


def _detect_roll_sign():
    """Probe pltpu.roll's rotation direction once, so the kernel's tap shifts are
    correct regardless of convention: returns sign s such that
    pltpu.roll(x, shift=(s*off) % S, axis=1)[:, j] == x[:, (j + off) % S]."""
    def k(x_ref, o_ref):
        o_ref[...] = pltpu.roll(x_ref[...], shift=1, axis=1)

    x = jax.lax.broadcasted_iota(jnp.int32, (8, 128), 1)
    y = pl.pallas_call(k, out_shape=jax.ShapeDtypeStruct((8, 128), jnp.int32))(x)
    first = int(y[0, 0])
    if first == 127:     # matches jnp.roll: element i -> i + shift
        return -1
    if first == 1:       # opposite convention: element i -> i - shift
        return 1
    raise AssertionError(f"unexpected pltpu.roll semantics (probe y[0,0] = {first})")


# ----------------------------------------------------------------------------
# The fused whole-model kernel: one grid step == one DetailNode applied to one
# batch element.  grid = (B, num_layers); the (z1; z2) state is carried in the
# VMEM-resident output block (same block index across the layer axis).
# ----------------------------------------------------------------------------
def _detail_node_kernel(alpha_ref, zin_ref, mask_ref,
                        sw_ref, sb_ref, dw_ref, db_ref,
                        aw1_ref, ab1_ref, aw2_ref, ab2_ref,
                        kw_ref, kb_ref,
                        out_ref, patch_ref, *, H, W, roll_sign):
    S = H * W
    layer = pl.program_id(1)

    # Layer 0: initialise the carried (z1; z2) state from the padded input block.
    @pl.when(layer == 0)
    def _():
        out_ref[...] = zin_ref[...]

    def tap(x, dy, dx, mask):
        """patch[:, h*W+w] = x[:, (h+dy)*W + (w+dx)] and 0 outside the image
        (== 'same' zero padding).  One XLU lane rotation + one masked multiply."""
        off = dy * W + dx
        shifted = x if off == 0 else pltpu.roll(x, shift=(roll_sign * off) % S, axis=1)
        return shifted * mask                       # mask (1, S) broadcasts over rows

    def fill_patches(x, taps, mask_base):
        """Stack the masked taps of x into the (T*C_PAD, S) bf16 scratch slab so the
        whole convolution collapses into one long-K MXU contraction."""
        for t, (dy, dx) in enumerate(taps):
            patch_ref[t * C_PAD:(t + 1) * C_PAD, :] = (
                tap(x, dy, dx, mask_ref[mask_base + t]).astype(jnp.bfloat16))

    def prelu(v, a):
        return jnp.where(v >= 0, v, a * v)          # scalar slope (nn.PReLU(init=0.5))

    def dilated_conv(row0, nrows):
        """Consume the 27-tap slab with one (nrows, 27*C_PAD)x(27*C_PAD, S) matmul."""
        w = dw_ref[0, row0:row0 + nrows, :]                          # bf16, lane-dense
        b = db_ref[0, row0:row0 + nrows, :]
        return jnp.dot(w, patch_ref[...], preferred_element_type=jnp.float32) + b

    def dyconv_tail(out2, irb, a, resid):
        """Dynamic_conv2d (attention MLP + expert aggregation + 3x3 conv) + PReLU
        + IRB residual, fully in-kernel."""
        # --- attention2d: global-avg-pool -> fc1 -> relu -> fc2 -> softmax(/T)
        pooled = jnp.mean(out2, axis=1, keepdims=True)               # (C_PAD, 1)
        w1 = aw1_ref[0, irb * HID_PAD:(irb + 1) * HID_PAD, :]        # (16, 48) f32
        b1 = ab1_ref[0, irb * HID_PAD:(irb + 1) * HID_PAD, :]
        h = jnp.maximum(
            jnp.dot(w1, pooled, preferred_element_type=jnp.float32) + b1, 0.0)
        w2 = aw2_ref[0, irb * K_EXPERTS:(irb + 1) * K_EXPERTS, :]    # (4, 16) f32
        b2 = ab2_ref[0, irb * K_EXPERTS:(irb + 1) * K_EXPERTS, :]
        logits = (jnp.dot(w2, h, preferred_element_type=jnp.float32) + b2) \
            * (1.0 / TEMPERATURE)                                    # (K, 1)

        # softmax over the K=4 experts, carried as (1,1) "scalar" values
        kidx = jax.lax.broadcasted_iota(jnp.int32, (K_EXPERTS, 1), 0)
        lk = [jnp.sum(jnp.where(kidx == k, logits, 0.0), axis=0, keepdims=True)
              for k in range(K_EXPERTS)]                             # K x (1,1)
        m = lk[0]
        for v in lk[1:]:
            m = jnp.maximum(m, v)
        ek = [jnp.exp(v - m) for v in lk]
        denom = ek[0]
        for v in ek[1:]:
            denom = denom + v
        att = [v / denom for v in ek]                                # K x (1,1)

        # --- 9-tap slab of out2 (reuses the first 9*C_PAD rows of the scratch)
        fill_patches(out2, CONV3X3_TAPS, mask_base=len(DILATED_TAPS))

        # --- expert aggregation hoisted out of the tap loop: one weighted pass
        #     over each lane-dense (C_PAD, 9*C_PAD) expert slab, then ONE matmul.
        base = irb * K_EXPERTS * C_PAD
        wagg = None
        bagg = None
        for k in range(K_EXPERTS):
            r0 = base + k * C_PAD
            wk = kw_ref[0, r0:r0 + C_PAD, :].astype(jnp.float32)     # (48, 432)
            bk = kb_ref[0, r0:r0 + C_PAD, :]                         # (48, 1)
            wagg = att[k] * wk if wagg is None else wagg + att[k] * wk
            bagg = att[k] * bk if bagg is None else bagg + att[k] * bk

        y = jnp.dot(wagg.astype(jnp.bfloat16), patch_ref[0:9 * C_PAD, :],
                    preferred_element_type=jnp.float32) + bagg
        return resid + prelu(y, a)                                   # x + PReLU(dyconv)

    # ------------------- DetailNode forward for this (batch, layer) ------------
    a_phi = alpha_ref[layer, 0]
    a_rho = alpha_ref[layer, 1]
    a_eta = alpha_ref[layer, 2]

    zcat = out_ref[...]                                              # carried (z1; z2)

    # shffleconv: 1x1 conv over 90 (padded to 96) channels == one matmul
    zs = jnp.dot(sw_ref[0], zcat.astype(jnp.bfloat16),
                 preferred_element_type=jnp.float32) + sb_ref[0]
    z1 = zs[:C_PAD, :]
    z2 = zs[C_PAD:, :]

    # z2 = z2 + theta_phi(z1)
    fill_patches(z1, DILATED_TAPS, mask_base=0)
    out2_phi = prelu(dilated_conv(0, C_PAD), a_phi)
    z2 = z2 + dyconv_tail(out2_phi, 0, a_phi, z1)

    # theta_rho(z2) / theta_eta(z2): both read z2, so they share the 27-tap slab;
    # their dilated convs run as one stacked 96-row matmul; rho never leaves VMEM.
    fill_patches(z2, DILATED_TAPS, mask_base=0)
    pre = dilated_conv(C_PAD, 2 * C_PAD)                             # (96, S)
    out2_rho = prelu(pre[:C_PAD, :], a_rho)
    out2_eta = prelu(pre[C_PAD:, :], a_eta)
    rho = dyconv_tail(out2_rho, 1, a_rho, z2)
    eta = dyconv_tail(out2_eta, 2, a_eta, z2)

    # affine-coupling epilogue: z1 = z1 * exp(theta_rho(z2)) + theta_eta(z2)
    z1 = z1 * jnp.exp(rho) + eta

    out_ref[:C_PAD, :] = z1.astype(out_ref.dtype)
    out_ref[C_PAD:, :] = z2.astype(out_ref.dtype)


# ----------------------------------------------------------------------------
# Wrapper: NCHW <-> lane-dense (C_pad, B*S) plumbing + the single pallas_call
# ----------------------------------------------------------------------------
def detail_feature_extraction(x_nchw, params, *, roll_sign):
    B, C, H, W = x_nchw.shape
    assert C == 2 * CIN, f"DetailFeatureExtraction expects {2 * CIN} channels, got {C}"
    S = H * W
    L = params["alpha"].shape[0]

    # NCHW -> (C, B*S) with each image's pixels contiguous on lanes; pad each
    # 45-channel coupling half to 48 sublane-aligned rows (pad rows stay zero).
    x = x_nchw.reshape(B, C, S).transpose(1, 0, 2).reshape(C, B * S)
    z = jnp.zeros((2 * C_PAD, B * S), jnp.float32)
    z = z.at[0:CIN].set(x[0:CIN])
    z = z.at[C_PAD:C_PAD + CIN].set(x[CIN:2 * CIN])

    masks = _tap_masks(DILATED_TAPS + CONV3X3_TAPS, H, W)            # (36, 1, S) f32

    kern = functools.partial(_detail_node_kernel, H=H, W=W, roll_sign=roll_sign)
    lsel = lambda b, l: (l, 0, 0)                                    # per-layer weights

    out = pl.pallas_call(
        kern,
        out_shape=jax.ShapeDtypeStruct((2 * C_PAD, B * S), jnp.float32),
        grid=(B, L),
        in_specs=[
            pl.BlockSpec(memory_space=pltpu.MemorySpace.SMEM),                     # alpha (L,3)
            pl.BlockSpec((2 * C_PAD, S), lambda b, l: (0, b)),                     # z_in
            pl.BlockSpec((N_TAPS, 1, S), lambda b, l: (0, 0, 0)),                  # masks
            pl.BlockSpec((1, 2 * C_PAD, 2 * C_PAD), lsel),                         # shuf_w
            pl.BlockSpec((1, 2 * C_PAD, 1), lsel),                                 # shuf_b
            pl.BlockSpec((1, 3 * C_PAD, 27 * C_PAD), lsel),                        # dil_w
            pl.BlockSpec((1, 3 * C_PAD, 1), lsel),                                 # dil_b
            pl.BlockSpec((1, 3 * HID_PAD, C_PAD), lsel),                           # att_w1
            pl.BlockSpec((1, 3 * HID_PAD, 1), lsel),                               # att_b1
            pl.BlockSpec((1, 3 * K_EXPERTS, HID_PAD), lsel),                       # att_w2
            pl.BlockSpec((1, 3 * K_EXPERTS, 1), lsel),                             # att_b2
            pl.BlockSpec((1, 3 * K_EXPERTS * C_PAD, 9 * C_PAD), lsel),             # dy_w
            pl.BlockSpec((1, 3 * K_EXPERTS * C_PAD, 1), lsel),                     # dy_b
        ],
        out_specs=pl.BlockSpec((2 * C_PAD, S), lambda b, l: (0, b)),
        scratch_shapes=[pltpu.VMEM((len(DILATED_TAPS) * C_PAD, S), jnp.bfloat16)],
        compiler_params=pltpu.CompilerParams(
            dimension_semantics=("parallel", "arbitrary")),
    )(params["alpha"], z, masks,
      params["shuf_w"], params["shuf_b"],
      params["dil_w"], params["dil_b"],
      params["att_w1"], params["att_b1"], params["att_w2"], params["att_b2"],
      params["dy_w"], params["dy_b"])

    y = jnp.concatenate([out[0:CIN], out[C_PAD:C_PAD + CIN]], axis=0)   # (90, B*S)
    return y.reshape(C, B, S).transpose(1, 0, 2).reshape(B, C, H, W)


# ----------------------------------------------------------------------------
# Deterministic synthetic parameters, stored directly in the packed/lane-dense
# kernel layouts (bf16 for the big matmul weights, f32 for biases / attention).
# ----------------------------------------------------------------------------
def _randn(key, shape, scale=0.02):
    return scale * jax.random.normal(key, shape, jnp.float32)


def _init_irb_packed(key):
    """One InvertedResidualBlock(45, 45) in packed layout (numpy blocks)."""
    ks = jax.random.split(key, 9)
    co3 = CIN // 3                                        # 15 channels per dilation

    # fused dilated convs: (C_PAD, 27*C_PAD); rows outside the dilation group zero
    dil_w = np.zeros((C_PAD, len(DILATED_TAPS) * C_PAD), np.float32)
    for g in range(3):
        wg = np.asarray(_randn(ks[g], (co3, CIN, 3, 3)))  # OIHW, dilation DILATIONS[g]
        for ky in range(3):
            for kx in range(3):
                t = 9 * g + 3 * ky + kx
                dil_w[g * co3:(g + 1) * co3, t * C_PAD:t * C_PAD + CIN] = wg[:, :, ky, kx]
    dil_b = np.zeros((C_PAD, 1), np.float32)
    dil_b[:CIN, 0] = np.asarray(_randn(ks[3], (CIN,)))

    # Dynamic_conv2d attention MLP (hidden = int(45*0.25)+1 = 12, padded to 16)
    aw1 = np.zeros((HID_PAD, C_PAD), np.float32)
    aw1[:HID, :CIN] = np.asarray(_randn(ks[4], (HID, CIN)))
    ab1 = np.zeros((HID_PAD, 1), np.float32)   # TODO(synk): canonical attention2d fc1 is bias-free
    aw2 = np.zeros((K_EXPERTS, HID_PAD), np.float32)
    aw2[:, :HID] = np.asarray(_randn(ks[5], (K_EXPERTS, HID)))
    ab2 = np.asarray(_randn(ks[6], (K_EXPERTS,))).reshape(K_EXPERTS, 1)

    # K expert 3x3 kernels, lane-dense per expert: rows k*C_PAD.., cols tap*C_PAD..
    dy_w = np.zeros((K_EXPERTS * C_PAD, 9 * C_PAD), np.float32)
    wk = np.asarray(_randn(ks[7], (K_EXPERTS, CIN, CIN, 3, 3)))        # (K, O, I, ky, kx)
    for k in range(K_EXPERTS):
        for ky in range(3):
            for kx in range(3):
                t = 3 * ky + kx
                dy_w[k * C_PAD:k * C_PAD + CIN, t * C_PAD:t * C_PAD + CIN] = wk[k, :, :, ky, kx]
    dy_b = np.zeros((K_EXPERTS * C_PAD, 1), np.float32)
    bk = np.asarray(_randn(ks[8], (K_EXPERTS, CIN)))
    for k in range(K_EXPERTS):
        dy_b[k * C_PAD:k * C_PAD + CIN, 0] = bk[k]

    return dict(dil_w=dil_w, dil_b=dil_b, aw1=aw1, ab1=ab1, aw2=aw2, ab2=ab2,
                dy_w=dy_w, dy_b=dy_b)


def _init_node_packed(key):
    """One DetailNode (shffleconv + theta_phi / theta_rho / theta_eta)."""
    ks = jax.random.split(key, 5)
    w90 = np.asarray(_randn(ks[0], (90, 90)))             # Conv2d(90, 90, 1) weight
    b90 = np.asarray(_randn(ks[1], (90,)))
    sw = np.zeros((2 * C_PAD, 2 * C_PAD), np.float32)
    sb = np.zeros((2 * C_PAD, 1), np.float32)
    sw[0:CIN, 0:CIN] = w90[0:CIN, 0:CIN]
    sw[0:CIN, C_PAD:C_PAD + CIN] = w90[0:CIN, CIN:2 * CIN]
    sw[C_PAD:C_PAD + CIN, 0:CIN] = w90[CIN:2 * CIN, 0:CIN]
    sw[C_PAD:C_PAD + CIN, C_PAD:C_PAD + CIN] = w90[CIN:2 * CIN, CIN:2 * CIN]
    sb[0:CIN, 0] = b90[0:CIN]
    sb[C_PAD:C_PAD + CIN, 0] = b90[CIN:2 * CIN]

    irbs = [_init_irb_packed(k) for k in ks[2:5]]         # phi, rho, eta
    cat = lambda name: np.concatenate([p[name] for p in irbs], axis=0)
    return dict(
        shuf_w=sw, shuf_b=sb,
        dil_w=cat("dil_w"), dil_b=cat("dil_b"),
        att_w1=cat("aw1"), att_b1=cat("ab1"), att_w2=cat("aw2"), att_b2=cat("ab2"),
        dy_w=cat("dy_w"), dy_b=cat("dy_b"),
        alpha=np.full((3,), 0.5, np.float32),             # nn.PReLU(init=0.5) per IRB
    )


def init_params(key, num_layers=3):
    nodes = [_init_node_packed(k) for k in jax.random.split(key, num_layers)]
    stack = lambda name: np.stack([n[name] for n in nodes], axis=0)
    return dict(
        alpha=jnp.asarray(stack("alpha")),                              # (L, 3) f32 (SMEM)
        shuf_w=jnp.asarray(stack("shuf_w"), jnp.bfloat16),              # (L, 96, 96)
        shuf_b=jnp.asarray(stack("shuf_b")),                            # (L, 96, 1)
        dil_w=jnp.asarray(stack("dil_w"), jnp.bfloat16),                # (L, 144, 1296)
        dil_b=jnp.asarray(stack("dil_b")),                              # (L, 144, 1)
        att_w1=jnp.asarray(stack("att_w1")),                            # (L, 48, 48)
        att_b1=jnp.asarray(stack("att_b1")),                            # (L, 48, 1)
        att_w2=jnp.asarray(stack("att_w2")),                            # (L, 12, 16)
        att_b2=jnp.asarray(stack("att_b2")),                            # (L, 12, 1)
        dy_w=jnp.asarray(stack("dy_w"), jnp.bfloat16),                  # (L, 576, 432)
        dy_b=jnp.asarray(stack("dy_b")),                                # (L, 576, 1)
    )


# ----------------------------------------------------------------------------
if __name__ == "__main__":
    key = jax.random.PRNGKey(0)
    k_x, k_p = jax.random.split(key)

    B, C, H, W = 2, 90, 16, 16                 # DetailNode requires 90 channels (2 x 45)
    x = 0.1 * jax.random.normal(k_x, (B, C, H, W), jnp.float32)    # NCHW like PyTorch
    params = init_params(k_p, num_layers=3)

    roll_sign = _detect_roll_sign()            # pin the lane-rotation convention
    fwd = jax.jit(functools.partial(detail_feature_extraction, roll_sign=roll_sign))

    y = fwd(x, params)
    jax.block_until_ready(y)

    assert y.shape == (B, C, H, W), y.shape
    assert bool(jnp.all(jnp.isfinite(y)))
    print("KERNEL_OK")
</pallas_src>

<mosaic_0001>
module attributes {stable_mosaic.version = 11 : i64} {
  func.func @k(%arg0: memref<8x128xi32, #tpu.memory_space<vmem>>, %arg1: memref<8x128xi32, #tpu.memory_space<vmem>>) attributes {dimension_semantics = [], scalar_prefetch = 0 : i64, scratch_operands = 0 : i64, tpu.core_type = #tpu.core_type<tc>} {
    %c0 = arith.constant 0 : index
    %c0_0 = arith.constant 0 : index
    %0 = vector.load %arg0[%c0, %c0_0] : memref<8x128xi32, #tpu.memory_space<vmem>>, vector<8x128xi32>
    %c1_i32 = arith.constant 1 : i32
    %1 = tpu.dynamic_rotate %0 by %c1_i32 dim 1 : vector<8x128xi32>, i32 -> vector<8x128xi32>
    %c0_1 = arith.constant 0 : index
    %c0_2 = arith.constant 0 : index
    %2 = vector.load %arg1[%c0_1, %c0_2] : memref<8x128xi32, #tpu.memory_space<vmem>>, vector<8x128xi32>
    tpu.vector_store %arg1[%c0_1, %c0_2], %1 {strides = array<i32>} : memref<8x128xi32, #tpu.memory_space<vmem>>, vector<8x128xi32>,
    return
  }
}

</mosaic_0001>

<bundles_post_ra>
// kernel: tpu_custom_call.1
= control target key start
LH: loop header
LB: loop body
LE: loop exit
PB: predicated region body
PF: predicated region fallthrough
CT: control target
= control target key end

     0   :  { %6 = vsyncpa [#allocation3], 0  ;;  %s128_s0 = inlined_call_operand.hbm [shape: s32[8,128], index: 0, kind: input, shape index: {}]   ;;  %s129_s1 = inlined_call_operand.hbm [shape: s32[8,128], index: 1, kind: output, shape index: {}]  }
   0x1   :  { %7 = vsyncpa [#allocation4], 0  ;;  %s91_s6 = smov [#allocation2]   ;;  %s43_s10 = scalar_lea.hbm %s128_s0, 128 }
   0x2   :  { %s14_s7 = sshll.u32 %s91_s6, 4  ;;  %p44_p0 = scmp.ne.s32.totalorder %s128_s0, %s43_s10  ;;  %s15_s7 = int_to_ptr.vmem [resolvable:$true] %s14_s7 }
   0x3   :  { %p47_p1 = scmp.lt.u32.totalorder %s43_s10, %s128_s0 }
   0x5   :  { %p49_p2 = pnand %p47_p1, %p44_p0 }
   0x7   :  { %52 = shalt.err (!%p49_p2)
}
   0x8   :  { %s53_s15 = scalar_lea.vmem %s15_s7, 128  ;;  %p58_p4 = scmp.lt.s32.totalorder %s15_s7, %s15_s7 }
   0x9   :  { %p54_p3 = scmp.ne.s32.totalorder %s15_s7, %s53_s15  ;;  %p59_p5 = scmp.lt.s32.totalorder %s53_s15, %s53_s15 }
   0xb   :  { %p60_p6 = por %p59_p5, %p58_p4 }
   0xd   :  { %p61_p7 = pnand %p60_p6, %p54_p3 }
   0xf   :  { %64 = shalt.err (!%p61_p7)
}
  0x10   :  { %17 = dma.hbm_to_vmem [thread:$0]  %s128_s0, 128, %s15_s7, [#allocation3]  }
  0x11   :  { %87 = dma.done.wait [#allocation3], 128  }
  0x12   :  { %88 = vsyncadd [#allocation3], 4294967168  ;;  %v21_v0 = vld [vmem:[#allocation2] sm:$0xff]  ;;  %s92_s18 = smov 1   ;;  %s93_s19 = smov [#allocation5]  }
  0x13   :  { %22 = vrot.lane.b32.xlu0 %v21_v0, %s92_s18  ;;  %s31_s20 = sshll.u32 %s93_s19, 4  ;;  %s32_s20 = int_to_ptr.vmem [resolvable:$true] %s31_s20 }
  0x14   :  { %s65_s21 = scalar_lea.vmem %s32_s20, 128  ;;  %p70_p9 = scmp.lt.s32.totalorder %s32_s20, %s32_s20 }
  0x15   :  { %p66_p8 = scmp.ne.s32.totalorder %s32_s20, %s65_s21  ;;  %p71_p10 = scmp.lt.s32.totalorder %s65_s21, %s65_s21 }
  0x17   :  { %p72_p11 = por %p71_p10, %p70_p9 }
  0x19   :  { %p73_p12 = pnand %p72_p11, %p66_p8 }
  0x85   :  { %v23_v1 = vpop.permute.xlu0 %22 }
  0x86   :  { %24 = vst [vmem:[#allocation5] sm:$0xff] %v23_v1 }
  0x87   :  { %76 = shalt.err (!%p73_p12)
}
  0x88   :  { %s77_s0 = scalar_lea.hbm %s129_s1, 128 }
  0x89   :  { %p78_p13 = scmp.ne.s32.totalorder %s129_s1, %s77_s0  ;;  %p81_p0 = scmp.lt.u32.totalorder %s77_s0, %s129_s1 }
  0x8b   :  { %p83_p1 = pnand %p81_p0, %p78_p13 }
  0x8d   :  { %86 = shalt.err (!%p83_p1)
}
  0x8e   :  { %34 = dma.vmem_to_hbm [thread:$0]  %s32_s20, 128, %s129_s1, [#allocation4]  }
  0x8f   :  { %89 = dma.done.wait [#allocation4], 128  }
  0x90   :  { %90 = vsyncadd [#allocation4], 4294967168 }
  0x91   :  { %38 = vsyncpa [#allocation3], 1 }
  0x92   :  { %39 = vsyncpa [#allocation4], 1 }

</bundles_post_ra>
